<compile_context>
chip_gen: v5e
topology: v5e:2x2
jax: 0.10.0
libtpu: 0.0.40
codegen_flags: <defaults>
</compile_context>

<pallas_src>
import jax
import jax.numpy as jnp
from jax.experimental import pallas as pl
from jax.experimental.pallas import tpu as pltpu

# ------------------------- model dimensions (small) -------------------------
B = 2
C3D, D3D, H3D, W3D = 4, 4, 8, 8           # x_resnet: [2, 4, 4, 8, 8]
C1D, L1D = 16, 8                          # x_conv1d: [2, 16, 8]
RESNET_FLAT = C3D * D3D                   # 16  (stand-in backbone feature size)
CONV_FLAT = C1D                           # 16
FLAT_SIZE = RESNET_FLAT + CONV_FLAT       # 32
FC_SIZE = 128                             # lane-aligned (torch default 1024, scaled down)
FC2 = FC_SIZE // 2                        # 64
OUT_CH = 7
BN_EPS = 1e-5
LANE = 128                                # TPU lane width

# Row offsets inside the packed parameter slab (all multiples of 8).
P_W1 = 0                                  # rows [0, 32)   : W1 (pool scale folded)
P_W2 = P_W1 + FLAT_SIZE                   # rows [32, 160) : W2 (BN1 folded), lanes [0,64) real
P_W3 = P_W2 + FC_SIZE                     # rows [160, 224): W3 (BN2 folded), lanes [0,7) real
P_BIAS = P_W3 + FC2                       # rows [224, 232): bias rows b1 / b2 / b3
SLAB_ROWS = P_BIAS + 8                    # 232


# ------------------------------ Pallas kernel -------------------------------
def fused_classifier_kernel(xr_ref, xc_ref, p_ref, out_ref):
    # Stand-in backbone get_feature: global SUM pool over the trailing
    # spatial / sequence axis (the 1/N is folded into W1's rows at pack time).
    feat_r = jnp.sum(xr_ref[...], axis=-1)          # [B, 16]
    feat_c = jnp.sum(xc_ref[...], axis=-1)          # [B, 16]

    bias = p_ref[P_BIAS:P_BIAS + 8, :]              # [8, 128] packed bias rows

    # Layer 1: torch.cat([feat_r, feat_c], 1) @ W1 + b1 as a split matmul
    # over W1 row blocks (no in-kernel concat / cross-lane shuffles).
    h1 = (jnp.dot(feat_r, p_ref[P_W1:P_W1 + RESNET_FLAT, :],
                  preferred_element_type=jnp.float32)
          + jnp.dot(feat_c, p_ref[P_W1 + RESNET_FLAT:P_W1 + FLAT_SIZE, :],
                    preferred_element_type=jnp.float32)
          + bias[0:1, :])
    h1 = jnp.maximum(h1, 0.0)                        # [B, 128]
    # BatchNorm1d(fc) (eval) folded into W2/b2; Dropout(0.5) identity in eval.

    # Layer 2 (BN2 folded into W3/b3). W2's lanes [64,128) and b2's padded
    # lanes are zero -> those lanes of h2 are exactly 0 after ReLU.
    h2 = jnp.dot(h1, p_ref[P_W2:P_W2 + FC_SIZE, :],
                 preferred_element_type=jnp.float32) + bias[1:2, :]
    h2 = jnp.maximum(h2, 0.0)                        # [B, 128]

    # Layer 3 + final ReLU: only the first FC2 lanes of h2 feed W3 ([64,128]).
    h3 = jnp.dot(h2[:, :FC2], p_ref[P_W3:P_W3 + FC2, :],
                 preferred_element_type=jnp.float32) + bias[2:3, :]
    out_ref[...] = jnp.maximum(h3, 0.0)              # lane-dense [B, 128]


# ------------------ one-time parameter fold + pack (model load) --------------
def pack_params(params):
    """Fold eval-mode BatchNorm1d into the *following* Linear, fold the
    global-average-pool 1/N into W1's rows, and pack everything into ONE
    lane-dense [232, 128] f32 slab.  Call once at model-load time."""
    hi = jax.lax.Precision.HIGHEST
    f32 = jnp.float32

    s1 = params["g1"] * jax.lax.rsqrt(params["v1"] + BN_EPS)       # (1, FC_SIZE)
    t1 = params["be1"] - params["m1"] * s1
    s2 = params["g2"] * jax.lax.rsqrt(params["v2"] + BN_EPS)       # (1, FC2)
    t2 = params["be2"] - params["m2"] * s2

    # Pool 1/N folded into W1 rows (kernel uses sum, not mean).
    pool_scale = jnp.concatenate(
        [jnp.full((RESNET_FLAT, 1), 1.0 / (H3D * W3D), f32),
         jnp.full((CONV_FLAT, 1), 1.0 / L1D, f32)], axis=0)        # (32, 1)
    w1s = params["w1"].astype(f32) * pool_scale                    # (32, 128)

    # BN1(relu(h1)) @ W2 + b2  ==  relu(h1) @ (W2 * s1^T) + (t1 @ W2 + b2)
    w2f = params["w2"].astype(f32) * s1.T                          # (128, 64)
    b2f = params["b2"] + jnp.dot(t1, params["w2"], precision=hi)   # (1, 64)
    w3f = params["w3"].astype(f32) * s2.T                          # (64, 7)
    b3f = params["b3"] + jnp.dot(t2, params["w3"], precision=hi)   # (1, 7)

    slab = jnp.zeros((SLAB_ROWS, LANE), f32)
    slab = slab.at[P_W1:P_W1 + FLAT_SIZE, :].set(w1s)
    slab = slab.at[P_W2:P_W2 + FC_SIZE, :FC2].set(w2f)
    slab = slab.at[P_W3:P_W3 + FC2, :OUT_CH].set(w3f)
    slab = slab.at[P_BIAS + 0, :].set(params["b1"][0].astype(f32))
    slab = slab.at[P_BIAS + 1, :FC2].set(b2f[0])
    slab = slab.at[P_BIAS + 2, :OUT_CH].set(b3f[0])
    return slab


# --------------------------------- forward -----------------------------------
def multimodal_embedding_forward(x_resnet, x_conv1d, param_slab):
    batch = x_conv1d.shape[0]
    # TODO(synk): ResNet3D / Conv1dNetwork get_feature bodies are not in the
    # provided source; stand-in = global average pool + flatten, with the pool
    # executed inside the Pallas kernel.
    xr = x_resnet.reshape(batch, RESNET_FLAT, H3D * W3D).astype(jnp.float32)
    xc = x_conv1d.astype(jnp.float32)

    vmem = pl.BlockSpec(memory_space=pltpu.MemorySpace.VMEM)
    out = pl.pallas_call(
        fused_classifier_kernel,
        out_shape=jax.ShapeDtypeStruct((batch, LANE), jnp.float32),
        in_specs=[vmem, vmem, vmem],
        out_specs=vmem,
    )(xr, xc, param_slab)
    # TODO(synk): at real sizes (fc=1024, large batch) add a batch grid axis
    # with dimension_semantics=("parallel",...) (2 TCs on v7x) and bf16 weight
    # casts with 256-wide N tiles on v6e/v7x; pointless at B=2.
    return out[:, :OUT_CH]


# --------------------------- pure-JAX reference ------------------------------
def reference_forward(x_resnet, x_conv1d, params):
    hi = jax.lax.Precision.HIGHEST
    batch = x_conv1d.shape[0]
    fr = jnp.mean(x_resnet, axis=(3, 4)).reshape(batch, -1)
    fc = jnp.mean(x_conv1d, axis=2)
    x = jnp.concatenate([fr, fc], axis=1)
    h1 = jnp.maximum(jnp.dot(x, params["w1"], precision=hi) + params["b1"], 0.0)
    h1 = (h1 - params["m1"]) * jax.lax.rsqrt(params["v1"] + BN_EPS) * params["g1"] + params["be1"]
    h2 = jnp.maximum(jnp.dot(h1, params["w2"], precision=hi) + params["b2"], 0.0)
    h2 = (h2 - params["m2"]) * jax.lax.rsqrt(params["v2"] + BN_EPS) * params["g2"] + params["be2"]
    h3 = jnp.maximum(jnp.dot(h2, params["w3"], precision=hi) + params["b3"], 0.0)
    return h3


# --------------------------- deterministic params ---------------------------
def init_params(key):
    ks = jax.random.split(key, 14)
    scale = 0.02
    return {
        # Linear weights stored as [in, out] (equivalent to torch [out, in].T)
        "w1": scale * jax.random.normal(ks[0], (FLAT_SIZE, FC_SIZE), jnp.float32),
        "b1": scale * jax.random.normal(ks[1], (1, FC_SIZE), jnp.float32),
        "g1": 1.0 + 0.1 * jax.random.normal(ks[2], (1, FC_SIZE), jnp.float32),
        "be1": 0.05 * jax.random.normal(ks[3], (1, FC_SIZE), jnp.float32),
        "m1": 0.1 * jax.random.normal(ks[4], (1, FC_SIZE), jnp.float32),
        "v1": jax.random.uniform(ks[5], (1, FC_SIZE), jnp.float32, 0.5, 1.5),
        "w2": scale * jax.random.normal(ks[6], (FC_SIZE, FC2), jnp.float32),
        "b2": scale * jax.random.normal(ks[7], (1, FC2), jnp.float32),
        "g2": 1.0 + 0.1 * jax.random.normal(ks[8], (1, FC2), jnp.float32),
        "be2": 0.05 * jax.random.normal(ks[9], (1, FC2), jnp.float32),
        "m2": 0.1 * jax.random.normal(ks[10], (1, FC2), jnp.float32),
        "v2": jax.random.uniform(ks[11], (1, FC2), jnp.float32, 0.5, 1.5),
        "w3": scale * jax.random.normal(ks[12], (FC2, OUT_CH), jnp.float32),
        "b3": scale * jax.random.normal(ks[13], (1, OUT_CH), jnp.float32),
    }


if __name__ == "__main__":
    key = jax.random.PRNGKey(0)
    k_res, k_conv, k_params = jax.random.split(key, 3)

    x_resnet = jax.random.normal(k_res, (B, C3D, D3D, H3D, W3D), jnp.float32)
    x_conv1d = jax.random.normal(k_conv, (B, C1D, L1D), jnp.float32)
    params = init_params(k_params)

    # One-time (model-load) fold + pack, OUTSIDE the per-call forward path.
    param_slab = jax.block_until_ready(pack_params(params))

    fwd = jax.jit(multimodal_embedding_forward)
    out = fwd(x_resnet, x_conv1d, param_slab)
    jax.block_until_ready(out)
    assert out.shape == (B, OUT_CH), out.shape

    ref = reference_forward(x_resnet, x_conv1d, params)
    assert jnp.allclose(out, ref, atol=1e-4, rtol=1e-3), float(jnp.max(jnp.abs(out - ref)))
    print("KERNEL_OK")
</pallas_src>

<mosaic_0001>
module attributes {stable_mosaic.version = 11 : i64} {
  func.func @fused_classifier_kernel(%arg0: memref<2x16x64xf32, #tpu.memory_space<vmem>>, %arg1: memref<2x16x8xf32, #tpu.memory_space<vmem>>, %arg2: memref<232x128xf32, #tpu.memory_space<vmem>>, %arg3: memref<2x128xf32, #tpu.memory_space<vmem>>) attributes {dimension_semantics = [], scalar_prefetch = 0 : i64, scratch_operands = 0 : i64, tpu.core_type = #tpu.core_type<tc>} {
    %c0 = arith.constant 0 : index
    %c0_0 = arith.constant 0 : index
    %c0_1 = arith.constant 0 : index
    %0 = vector.load %arg0[%c0, %c0_0, %c0_1] : memref<2x16x64xf32, #tpu.memory_space<vmem>>, vector<2x16x64xf32>
    %cst = arith.constant dense<0.000000e+00> : vector<2x16xf32>
    %1 = vector.multi_reduction <add>, %0, %cst [2] : vector<2x16x64xf32> to vector<2x16xf32>
    %c0_2 = arith.constant 0 : index
    %c0_3 = arith.constant 0 : index
    %c0_4 = arith.constant 0 : index
    %2 = vector.load %arg1[%c0_2, %c0_3, %c0_4] : memref<2x16x8xf32, #tpu.memory_space<vmem>>, vector<2x16x8xf32>
    %cst_5 = arith.constant dense<0.000000e+00> : vector<2x16xf32>
    %3 = vector.multi_reduction <add>, %2, %cst_5 [2] : vector<2x16x8xf32> to vector<2x16xf32>
    %c224 = arith.constant 224 : index
    %c0_6 = arith.constant 0 : index
    %4 = vector.load %arg2[%c224, %c0_6] : memref<232x128xf32, #tpu.memory_space<vmem>>, vector<8x128xf32>
    %c0_7 = arith.constant 0 : index
    %c0_8 = arith.constant 0 : index
    %5 = vector.load %arg2[%c0_7, %c0_8] : memref<232x128xf32, #tpu.memory_space<vmem>>, vector<16x128xf32>
    %cst_9 = arith.constant dense<0.000000e+00> : vector<2x128xf32>
    %6 = tpu.matmul %1, %5, %cst_9 {dimension_numbers = #tpu.dot_dimension_numbers<[1], [0], [0], [1], [0, 0, 1, 1], [], []>} : vector<2x16xf32>, vector<16x128xf32>, vector<2x128xf32> -> vector<2x128xf32>
    %c16 = arith.constant 16 : index
    %c0_10 = arith.constant 0 : index
    %7 = vector.load %arg2[%c16, %c0_10] : memref<232x128xf32, #tpu.memory_space<vmem>>, vector<16x128xf32>
    %cst_11 = arith.constant dense<0.000000e+00> : vector<2x128xf32>
    %8 = tpu.matmul %3, %7, %cst_11 {dimension_numbers = #tpu.dot_dimension_numbers<[1], [0], [0], [1], [0, 0, 1, 1], [], []>} : vector<2x16xf32>, vector<16x128xf32>, vector<2x128xf32> -> vector<2x128xf32>
    %9 = arith.addf %6, %8 : vector<2x128xf32>
    %10 = vector.extract_strided_slice %4 {offsets = [0, 0], sizes = [1, 128], strides = [1, 1]} : vector<8x128xf32> to vector<1x128xf32>
    %11 = vector.broadcast %10 : vector<1x128xf32> to vector<2x128xf32>
    %12 = arith.addf %9, %11 : vector<2x128xf32>
    %cst_12 = arith.constant 0.000000e+00 : f32
    %13 = vector.broadcast %cst_12 : f32 to vector<2x128xf32>
    %14 = arith.maximumf %12, %13 : vector<2x128xf32>
    %c32 = arith.constant 32 : index
    %c0_13 = arith.constant 0 : index
    %15 = vector.load %arg2[%c32, %c0_13] : memref<232x128xf32, #tpu.memory_space<vmem>>, vector<128x128xf32>
    %cst_14 = arith.constant dense<0.000000e+00> : vector<2x128xf32>
    %16 = tpu.matmul %14, %15, %cst_14 {dimension_numbers = #tpu.dot_dimension_numbers<[1], [0], [0], [1], [0, 0, 1, 1], [], []>} : vector<2x128xf32>, vector<128x128xf32>, vector<2x128xf32> -> vector<2x128xf32>
    %17 = vector.extract_strided_slice %4 {offsets = [1, 0], sizes = [1, 128], strides = [1, 1]} : vector<8x128xf32> to vector<1x128xf32>
    %18 = vector.broadcast %17 : vector<1x128xf32> to vector<2x128xf32>
    %19 = arith.addf %16, %18 : vector<2x128xf32>
    %cst_15 = arith.constant 0.000000e+00 : f32
    %20 = vector.broadcast %cst_15 : f32 to vector<2x128xf32>
    %21 = arith.maximumf %19, %20 : vector<2x128xf32>
    %22 = vector.extract_strided_slice %21 {offsets = [0, 0], sizes = [2, 64], strides = [1, 1]} : vector<2x128xf32> to vector<2x64xf32>
    %c160 = arith.constant 160 : index
    %c0_16 = arith.constant 0 : index
    %23 = vector.load %arg2[%c160, %c0_16] : memref<232x128xf32, #tpu.memory_space<vmem>>, vector<64x128xf32>
    %cst_17 = arith.constant dense<0.000000e+00> : vector<2x128xf32>
    %24 = tpu.matmul %22, %23, %cst_17 {dimension_numbers = #tpu.dot_dimension_numbers<[1], [0], [0], [1], [0, 0, 1, 1], [], []>} : vector<2x64xf32>, vector<64x128xf32>, vector<2x128xf32> -> vector<2x128xf32>
    %25 = vector.extract_strided_slice %4 {offsets = [2, 0], sizes = [1, 128], strides = [1, 1]} : vector<8x128xf32> to vector<1x128xf32>
    %26 = vector.broadcast %25 : vector<1x128xf32> to vector<2x128xf32>
    %27 = arith.addf %24, %26 : vector<2x128xf32>
    %cst_18 = arith.constant 0.000000e+00 : f32
    %28 = vector.broadcast %cst_18 : f32 to vector<2x128xf32>
    %29 = arith.maximumf %27, %28 : vector<2x128xf32>
    %c0_19 = arith.constant 0 : index
    %c0_20 = arith.constant 0 : index
    %30 = vector.load %arg3[%c0_19, %c0_20] : memref<2x128xf32, #tpu.memory_space<vmem>>, vector<2x128xf32>
    tpu.vector_store %arg3[%c0_19, %c0_20], %29 {strides = array<i32>} : memref<2x128xf32, #tpu.memory_space<vmem>>, vector<2x128xf32>,
    return
  }
}

</mosaic_0001>

<bundles_post_ra>
// kernel: multimodal_embedding_forward.1
= control target key start
LH: loop header
LB: loop body
LE: loop exit
PB: predicated region body
PF: predicated region fallthrough
CT: control target
= control target key end

     0   :  { %vm36_vm0 = vcmask 64512   ;;  %vm19_vm1 = vcmask 523264   ;;  %s395_s0 = inlined_call_operand.vmem [shape: f32[2,16,64], index: 0, kind: input, shape index: {}]   ;;  %s396_s1 = inlined_call_operand.vmem [shape: f32[2,16,8], index: 1, kind: input, shape index: {}]   ;;  %s397_s2 = inlined_call_operand.vmem [shape: f32[232,128], index: 2, kind: input, shape index: {}]   ;;  %s398_s3 = inlined_call_operand.hbm [shape: f32[2,128], index: 3, kind: output, shape index: {}]  }
   0x1   :  { %v32_v0 = vld [vmem:[%s396_s1] sm:$0xff]  ;;  %v17_v1 = vld [vmem:[%s395_s0 + $0x10] sm:$0xff] }
   0x2   :  { %v15_v2 = vld [vmem:[%s395_s0] sm:$0xff]  ;;  %v37_v3 = vsel %vm36_vm0, %v32_v0, 0.0  ;;  %v26_v4 = vsel %vm19_vm1, %v17_v1, 0.0 }
   0x3   :  { %v20_v5 = vsel %vm19_vm1, %v15_v2, 0.0  ;;  %38 = vadd.xlane.f32.xlu2 %v37_v3  ;;  %27 = vadd.xlane.f32.xlu1 %v26_v4 }
   0x4   :  { %21 = vadd.xlane.f32.xlu0 %v20_v5 }
   0x5   :  { %8 = vsyncpa [#allocation3], 0  ;;  %v33_v6 = vld [vmem:[%s396_s1 + $0x8] sm:$0xff]  ;;  %v18_v7 = vld [vmem:[%s395_s0 + $0x18] sm:$0xff]  ;;  %v58_v26 = vlaneseq  ;;  %vm63_vm2 = vcmask 130112   ;;  %vm68_vm3 = vcmask 1041409  }
   0x6   :  { %v16_v8 = vld [vmem:[%s395_s0 + $0x8] sm:$0xff]  ;;  %v40_v9 = vsel %vm36_vm0, %v33_v6, 0.0  ;;  %v29_v10 = vsel %vm19_vm1, %v18_v7, 0.0  ;;  %v35_v12 = vld [vmem:[%s396_s1 + $0x18] sm:$0xff]  ;;  %v34_v13 = vld [vmem:[%s396_s1 + $0x10] sm:$0xff]  ;;  %vm70_vm4 = vcmask 130048  }
   0x7   :  { %v23_v11 = vsel %vm19_vm1, %v16_v8, 0.0  ;;  %v46_v14 = vsel %vm36_vm0, %v35_v12, 0.0  ;;  %v43_v15 = vsel %vm36_vm0, %v34_v13, 0.0  ;;  %v51_v16 = vld [vmem:[%s397_s2 + $0x8] sm:$0xff]  ;;  %v50_v17 = vld [vmem:[%s397_s2] sm:$0xff]  ;;  %v53_v18 = vld [vmem:[%s397_s2 + $0x18] sm:$0xff] }
   0x8   :  { %120 = vmatpush.msra.mxu1 %v51_v16  ;;  %v52_v19 = vld [vmem:[%s397_s2 + $0x10] sm:$0xff]  ;;  %87 = vmatpush.msra.mxu0 %v53_v18  ;;  %v144_v20 = vld [vmem:[%s397_s2 + $0x98] sm:$0xff]  ;;  %v142_v22 = vld [vmem:[%s397_s2 + $0x88] sm:$0xff]  ;;  %v59_v31 = vand.u32 127, %v58_v26  ;;  %s247_s0 = smov [#allocation2]   ;;  %s208_s4 = sshll.u32 %s398_s3, 4  ;;  %s209_s4 = int_to_ptr.hbm [resolvable:$true] %s208_s4 }
   0x9   :  { %v143_v21 = vld [vmem:[%s397_s2 + $0x90] sm:$0xff]  ;;  %146 = vmatpush.msra.mxu2 %v144_v20  ;;  %v141_v23 = vld [vmem:[%s397_s2 + $0x80] sm:$0xff]  ;;  %v140_v24 = vld [vmem:[%s397_s2 + $0x78] sm:$0xff]  ;;  %s206_s28 = sshll.u32 %s247_s0, 4  ;;  %s207_s28 = int_to_ptr.vmem [resolvable:$true] %s206_s28 }
   0xa   :  { %121 = vmatpush.msra.mxu1 %v50_v17  ;;  %88 = vmatpush.msra.mxu0 %v52_v19  ;;  %v139_v25 = vld [vmem:[%s397_s2 + $0x70] sm:$0xff]  ;;  %v138_v28 = vld [vmem:[%s397_s2 + $0x68] sm:$0xff]  ;;  %v137_v30 = vld [vmem:[%s397_s2 + $0x60] sm:$0xff]  ;;  %v61_v33 = vadd.s32 4294967288, %v59_v31 }
   0xb   :  { %41 = vadd.xlane.f32.xlu2 %v40_v9  ;;  %30 = vadd.xlane.f32.xlu1 %v29_v10  ;;  %v136_v53 = vld [vmem:[%s397_s2 + $0x58] sm:$0xff]  ;;  %v135_v54 = vld [vmem:[%s397_s2 + $0x50] sm:$0xff]  ;;  %v134_v55 = vld [vmem:[%s397_s2 + $0x48] sm:$0xff] }
   0xc   :  { %24 = vadd.xlane.f32.xlu0 %v23_v11  ;;  %147 = vmatpush.msra.mxu2 %v143_v21  ;;  %v133_v56 = vld [vmem:[%s397_s2 + $0x40] sm:$0xff]  ;;  %v132_v57 = vld [vmem:[%s397_s2 + $0x38] sm:$0xff]  ;;  %v131_v58 = vld [vmem:[%s397_s2 + $0x30] sm:$0xff] }
   0xd   :  { %v130_v59 = vld [vmem:[%s397_s2 + $0x28] sm:$0xff]  ;;  %v129_v60 = vld [vmem:[%s397_s2 + $0x20] sm:$0xff]  ;;  %v174_v61 = vld [vmem:[%s397_s2 + $0xd8] sm:$0xff] }
   0xe   :  { %148 = vmatpush.msra.mxu2 %v142_v22  ;;  %v173_v62 = vld [vmem:[%s397_s2 + $0xd0] sm:$0xff]  ;;  %187 = vmatpush.msra.mxu3 %v174_v61  ;;  %v172_v63 = vld [vmem:[%s397_s2 + $0xc8] sm:$0xff]  ;;  %v171_v0 = vld [vmem:[%s397_s2 + $0xc0] sm:$0xff] }
   0xf   :  { %v170_v1 = vld [vmem:[%s397_s2 + $0xb8] sm:$0xff]  ;;  %v49_v2 = vld [vmem:[%s397_s2 + $0xe0] sm:$0xff]  ;;  %v169_v9 = vld [vmem:[%s397_s2 + $0xb0] sm:$0xff] }
  0x10   :  { %149 = vmatpush.msra.mxu2 %v141_v23  ;;  %188 = vmatpush.msra.mxu3 %v173_v62  ;;  %v126_v3 = vperm.slane %v49_v2, 0  ;;  %v168_v10 = vld [vmem:[%s397_s2 + $0xa8] sm:$0xff]  ;;  %v167_v11 = vld [vmem:[%s397_s2 + $0xa0] sm:$0xff]  ;;  %v145_v12 = vperm.slane %v49_v2, 1  ;;  %v175_v16 = vperm.slane %v49_v2, 2 }
  0x12   :  { %150 = vmatpush.msra.mxu2 %v140_v24  ;;  %189 = vmatpush.msra.mxu3 %v172_v63 }
  0x13   :  { %47 = vadd.xlane.f32.xlu1 %v46_v14 }
  0x14   :  { %44 = vadd.xlane.f32.xlu0 %v43_v15  ;;  %151 = vmatpush.msra.mxu2 %v139_v25 }
  0x15   :  { %190 = vmatpush.msra.mxu3 %v171_v0 }
  0x16   :  { %152 = vmatpush.msra.mxu2 %v138_v28 }
  0x17   :  { %191 = vmatpush.msra.mxu3 %v170_v1 }
  0x18   :  { %153 = vmatpush.msra.mxu2 %v137_v30 }
  0x19   :  { %192 = vmatpush.msra.mxu3 %v169_v9 }
  0x1a   :  { %154 = vmatpush.msra.mxu2 %v136_v53 }
  0x1b   :  { %193 = vmatpush.msra.mxu3 %v168_v10 }
  0x1c   :  { %155 = vmatpush.msra.mxu2 %v135_v54 }
  0x1d   :  { %194 = vmatpush.msra.mxu3 %v167_v11 }
  0x1e   :  { %156 = vmatpush.msra.mxu2 %v134_v55 }
  0x20   :  { %157 = vmatpush.msra.mxu2 %v133_v56 }
  0x22   :  { %158 = vmatpush.msra.mxu2 %v132_v57 }
  0x24   :  { %159 = vmatpush.msra.mxu2 %v131_v58 }
  0x26   :  { %160 = vmatpush.msra.mxu2 %v130_v59 }
  0x28   :  { %161 = vmatpush.msra.mxu2 %v129_v60 }
  0x76   :  { %v28_v27 = vpop.xlane.xlu1 %27  ;;  %v39_v32 = vpop.xlane.xlu2 %38 }
  0x77   :  { %v22_v29 = vpop.xlane.xlu0 %21  ;;  %v100_v35 = vperm.slane %v28_v27, %v59_v31  ;;  %v60_v44 = vperm.slane %v39_v32, %v59_v31 }
  0x78   :  { %v97_v38 = vperm.slane %v22_v29, %v59_v31 }
  0x7e   :  { %v31_v34 = vpop.xlane.xlu1 %30  ;;  %v42_v42 = vpop.xlane.xlu2 %41 }
  0x7f   :  { %v101_v36 = vperm.slane %v31_v34, %v61_v33  ;;  %v25_v37 = vpop.xlane.xlu0 %24  ;;  %v62_v45 = vperm.slane %v42_v42, %v61_v33 }
  0x80   :  { %v98_v39 = vperm.slane %v25_v37, %v61_v33 }
  0x81   :  { %v102_v40 = vsel %vm63_vm2, %v101_v36, %v100_v35  ;;  %v64_v50 = vsel %vm63_vm2, %v62_v45, %v60_v44 }
  0x82   :  { %v99_v41 = vsel %vm63_vm2, %v98_v39, %v97_v38 }
  0x83   :  { %v103_v43 = vsel %vm68_vm3, %v102_v40, %v99_v41 }
  0x84   :  { %218 = vmatmul.msk.f32.vlgmr.msra.gmra.mxu1 %vm70_vm4, %v103_v43 }
  0x86   :  { %v48_v46 = vpop.xlane.xlu1 %47 }
  0x87   :  { %v66_v47 = vperm.slane %v48_v46, %v61_v33  ;;  %v45_v48 = vpop.xlane.xlu0 %44 }
  0x88   :  { %v65_v49 = vperm.slane %v45_v48, %v59_v31 }
  0x8a   :  { %v67_v51 = vsel %vm63_vm2, %v66_v47, %v65_v49 }
  0x8b   :  { %v69_v52 = vsel %vm68_vm3, %v67_v51, %v64_v50 }
  0x8c   :  { %217 = vmatmul.msk.f32.vlgmr.msra.gmra.mxu0 %vm70_vm4, %v69_v52 }
 0x101   :  { %v123_v4 = vpop.f32.mrf.mxu1 }
 0x109   :  { %v90_v5 = vpop.f32.mrf.mxu0 }
 0x10a   :  { %v124_v6 = vadd.f32 %v123_v4, %v90_v5 }
 0x10c   :  { %v127_v7 = vadd.f32 %v126_v3, %v124_v6 }
 0x10e   :  { %v128_v8 = vmax.f32 %v127_v7, 0.0 }
 0x110   :  { %162 = vmatmul.f32.vlgmr.msra.gmra.mxu2 %v128_v8 }
 0x193   :  { %v163_v13 = vpop.f32.mrf.mxu2 }
 0x194   :  { %v164_v14 = vadd.f32 %v163_v13, %v145_v12 }
 0x196   :  { %v166_v15 = vmax.f32 %v164_v14, 0.0 }
 0x198   :  { %219 = vmatmul.msk.f32.vlgmr.msra.gmra.mxu3 %vm19_vm1, %v166_v15 }
 0x21b   :  { %v196_v17 = vpop.f32.mrf.mxu3 }
 0x21c   :  { %v197_v18 = vadd.f32 %v196_v17, %v175_v16 }
 0x21e   :  { %v199_v19 = vmax.f32 %v197_v18, 0.0 }
 0x220   :  { %200 = vst [vmem:[#allocation2] sm:$0x3] %v199_v19 }
 0x221   :  { %211 = dma.vmem_to_hbm [thread:$0]  %s207_s28, 32, %s209_s4, [#allocation3]  }
 0x222   :  { %245 = dma.done.wait [#allocation3], 32  }
 0x223   :  { %246 = vsyncadd [#allocation3], 4294967264 }
 0x224   :  { %216 = vsyncpa [#allocation3], 1 }

</bundles_post_ra>
